<compile_context>
chip_gen: v5e
topology: v5e:2x2
jax: 0.10.0
libtpu: 0.0.40
codegen_flags: <defaults>
</compile_context>

<pallas_src>
import functools

import jax
import jax.numpy as jnp
from jax import lax
from jax.experimental import pallas as pl
from jax.experimental.pallas import tpu as pltpu


_TILE_BYTES = 4 * 1024 * 1024      # HBM bytes of input streamed per grid step
_VMEM_LIMIT = 48 * 1024 * 1024     # fits v7x's 64 MiB/TC with headroom (v5e/v6e: 128 MiB)
_TEMP_BUDGET = 24 * 1024 * 1024    # budget for in-kernel f32 tile temporaries


def _round_up(x, m):
    return ((x + m - 1) // m) * m


def _seg_sum(x, seg_bf16):
    """Segmented lane-sum of `x` via two native bf16 MXU passes (hi/lo split).

    seg_bf16 is a (width, width) 0/1 block-diagonal selector (exact in bf16),
    so x @ seg broadcasts each group's sum to every lane of that group.
    The hi/lo split keeps ~17 bits of the f32 mantissa (=> ~1e-5 relative
    error) at 2 MXU passes per call instead of 6 (HIGHEST), which keeps the
    packed path under the HBM shadow on v5e.
    """
    hi = x.astype(jnp.bfloat16)
    lo = (x - hi.astype(jnp.float32)).astype(jnp.bfloat16)
    return (jnp.dot(hi, seg_bf16, preferred_element_type=jnp.float32) +
            jnp.dot(lo, seg_bf16, preferred_element_type=jnp.float32))


def _finish(diff, ss, a, b, o_ref, *, eps, d_hid):
    # Unbiased variance (torch.std default divides by N-1).
    inv_nm1 = 1.0 / (d_hid - 1) if d_hid > 1 else float("nan")
    sigma = jnp.sqrt(ss * jnp.float32(inv_nm1))
    # Exact reciprocal/divide: this kernel is HBM-bound, so it is free and
    # removes the ~1e-3 error of the approximate EUP reciprocal.
    inv = jnp.float32(1.0) / (sigma + jnp.float32(eps))
    o_ref[...] = (diff * inv * a + b).astype(o_ref.dtype)


def _ln_rowwise_kernel(z_ref, a_ref, b_ref, o_ref, *, eps, d_hid, width):
    # One logical row per sublane row.  If width > d_hid the trailing lanes are
    # zero padding added by the wrapper; mask them out of the statistics.
    z = z_ref[...].astype(jnp.float32)                        # (tile_m, width)
    mu = jnp.sum(z, axis=-1, keepdims=True) * jnp.float32(1.0 / d_hid)
    diff = z - mu
    if width != d_hid:
        lane = lax.broadcasted_iota(jnp.int32, (1, width), 1)
        diff = jnp.where(lane < d_hid, diff, jnp.float32(0.0))
    ss = jnp.sum(diff * diff, axis=-1, keepdims=True)
    _finish(diff, ss, a_ref[...], b_ref[...], o_ref, eps=eps, d_hid=d_hid)


def _ln_packed_kernel(z_ref, a_ref, b_ref, seg_ref, o_ref, *, eps, d_hid):
    # g = 128 // d_hid logical rows packed per 128-lane row (free, row-major
    # reshape).  Segmented per-group sums run on the otherwise idle MXU.
    z = z_ref[...].astype(jnp.float32)                        # (tile_m, 128)
    seg = seg_ref[...]                                        # (128, 128) bf16
    mu = _seg_sum(z, seg) * jnp.float32(1.0 / d_hid)          # group mean, bcast
    diff = z - mu
    ss = _seg_sum(diff * diff, seg)                           # group sum of squares
    _finish(diff, ss, a_ref[...], b_ref[...], o_ref, eps=eps, d_hid=d_hid)


def layer_normalization(z, a_2, b_2, eps=0.001):
    """Pallas implementation of the PyTorch LayerNormalization.forward."""
    # Mirror `if z.size(1) == 1: return z` (static check on axis 1).
    if z.shape[1] == 1:
        return z

    orig_shape = z.shape
    d_hid = orig_shape[-1]
    z2d = z.reshape(-1, d_hid)                                # (N, d_hid) row-major
    n_rows = z2d.shape[0]

    itemsize = jnp.dtype(z.dtype).itemsize
    sub = {4: 8, 2: 16, 1: 32}.get(itemsize, 8)               # sublane packing

    # Lane layout selection:
    #   A) d_hid divides 128 -> pack g rows per 128-lane row (pure reshape).
    #   B) d_hid multiple of 128 -> row-wise, already lane-dense.
    #   C) otherwise -> zero-pad lanes to a multiple of 128 and mask in-kernel,
    #      so every load/store stays an unmasked full-width vld/vst.
    lane_pad = 0
    if d_hid % 128 == 0:
        g, width = 1, d_hid
    elif 128 % d_hid == 0:
        g, width = 128 // d_hid, 128
    else:
        g = 1
        width = _round_up(d_hid, 128)
        lane_pad = width - d_hid

    # Row padding only to a multiple of g (<= g-1 rows) so the packing reshape
    # is valid.  We never pad up to a full tile: the grid is pl.cdiv and the
    # ragged last block is handled by Pallas (OOB reads are garbage but rows /
    # groups are independent; OOB writes are discarded).
    row_pad = (-n_rows) % g
    zp = z2d
    if row_pad or lane_pad:
        zp = jnp.pad(zp, ((0, row_pad), (0, lane_pad)))       # zero fill
    m = (n_rows + row_pad) // g                               # packed row count
    zp = zp.reshape(m, width)

    # Tile rows: constant HBM bytes per grid step (itemsize-aware), capped so
    # ~4 live f32 tile temporaries fit the VMEM budget, sublane aligned.
    rows_bytes = max(1, _TILE_BYTES // (width * itemsize))
    rows_vmem = max(1, _TEMP_BUDGET // (width * 4 * 4))
    tile_m = max(sub, (min(rows_bytes, rows_vmem) // sub) * sub)
    tile_m = min(tile_m, _round_up(m, sub))
    # TODO(synk): add a lane-axis grid split for pathologically wide d_hid
    # where even an 8-row tile would overflow the VMEM budget.

    # Megacore friendliness (v7x: 2 TCs/chip): prefer an even grid of >= 4
    # steps when the input is big enough, so both cores get balanced work and
    # each still overlaps DMA with compute.  Best effort; no cost at large N.
    steps = pl.cdiv(m, tile_m)
    if m >= 4 * sub:
        want = max(4, steps + (steps % 2))
        tile_m = min(tile_m, max(sub, _round_up(pl.cdiv(m, want), sub)))
        steps = pl.cdiv(m, tile_m)
    grid = (steps,)

    # Scale / shift: pre-cast to f32, lane-tiled (and zero lane-padded) in the
    # wrapper so there is no per-grid-step convert/broadcast work.
    a_row = jnp.tile(a_2.astype(jnp.float32).reshape(1, d_hid), (1, g))
    b_row = jnp.tile(b_2.astype(jnp.float32).reshape(1, d_hid), (1, g))
    if lane_pad:
        a_row = jnp.pad(a_row, ((0, 0), (0, lane_pad)))
        b_row = jnp.pad(b_row, ((0, 0), (0, lane_pad)))

    row_spec = pl.BlockSpec((tile_m, width), lambda i: (i, 0))
    par_spec = pl.BlockSpec((1, width), lambda i: (0, 0))

    if g > 1:
        # Single constant 0/1 block-diagonal group selector (exact in bf16).
        group = jnp.arange(width, dtype=jnp.int32) // d_hid
        seg = (group[:, None] == group[None, :]).astype(jnp.bfloat16)
        kernel = functools.partial(_ln_packed_kernel, eps=eps, d_hid=d_hid)
        in_specs = [row_spec, par_spec, par_spec,
                    pl.BlockSpec((width, width), lambda i: (0, 0))]
        operands = (zp, a_row, b_row, seg)
    else:
        kernel = functools.partial(_ln_rowwise_kernel, eps=eps, d_hid=d_hid,
                                   width=width)
        in_specs = [row_spec, par_spec, par_spec]
        operands = (zp, a_row, b_row)

    out_p = pl.pallas_call(
        kernel,
        out_shape=jax.ShapeDtypeStruct((m, width), z.dtype),
        grid_spec=pltpu.PrefetchScalarGridSpec(
            num_scalar_prefetch=0,
            grid=grid,
            in_specs=in_specs,
            out_specs=row_spec,
        ),
        compiler_params=pltpu.CompilerParams(
            dimension_semantics=("parallel",),
            vmem_limit_bytes=_VMEM_LIMIT,
        ),
    )(*operands)

    if lane_pad:
        out2d = out_p[:, :d_hid]
    else:
        out2d = out_p.reshape(m * g, d_hid)
        if row_pad:
            out2d = out2d[:n_rows]
    return out2d.reshape(orig_shape)


def _reference(z, a_2, b_2, eps=0.001):
    """Pure-JAX reference matching the PyTorch forward."""
    if z.shape[1] == 1:
        return z
    z32 = z.astype(jnp.float32)
    mu = jnp.mean(z32, axis=-1, keepdims=True)
    d = z.shape[-1]
    var = jnp.sum((z32 - mu) ** 2, axis=-1, keepdims=True) / (d - 1)  # unbiased
    sigma = jnp.sqrt(var)
    ln = (z32 - mu) / (sigma + eps)
    out = ln * a_2.astype(jnp.float32) + b_2.astype(jnp.float32)
    return out.astype(z.dtype)


if __name__ == "__main__":
    key = jax.random.PRNGKey(0)
    k_z, k_a, k_b, k_z2, k_z3, k_z4 = jax.random.split(key, 6)

    # Kernel is now near-exact (exact divide, hi/lo bf16 segmented sums);
    # tolerance only covers accumulation-order differences.
    ATOL = RTOL = 2e-3

    # Case 1: d_hid = 32 < 128 -> lane-packed path (4 rows per 128-lane row).
    B, S, D = 2, 8, 32
    z = jax.random.normal(k_z, (B, S, D), dtype=jnp.float32)
    a_2 = 1.0 + 0.1 * jax.random.normal(k_a, (D,), dtype=jnp.float32)
    b_2 = 0.1 * jax.random.normal(k_b, (D,), dtype=jnp.float32)
    out = jax.block_until_ready(layer_normalization(z, a_2, b_2, eps=0.001))
    ref = _reference(z, a_2, b_2, eps=0.001)
    assert out.shape == z.shape and out.dtype == z.dtype
    assert jnp.allclose(out, ref, atol=ATOL, rtol=RTOL), "mismatch (packed path)"

    # Case 2: ragged row count (15 rows) -> <= g-1 row pad + ragged last block.
    z3 = jax.random.normal(k_z3, (3, 5, D), dtype=jnp.float32)
    out3 = jax.block_until_ready(layer_normalization(z3, a_2, b_2, eps=0.001))
    ref3 = _reference(z3, a_2, b_2, eps=0.001)
    assert jnp.allclose(out3, ref3, atol=ATOL, rtol=RTOL), "mismatch (ragged rows)"

    # Case 3: d_hid = 256 (multiple of 128) -> aligned row-wise path.
    D2 = 256
    z2 = jax.random.normal(k_z2, (2, 4, D2), dtype=jnp.float32)
    a2 = jnp.ones((D2,), dtype=jnp.float32)
    b2 = jnp.zeros((D2,), dtype=jnp.float32)
    out2 = jax.block_until_ready(layer_normalization(z2, a2, b2, eps=0.001))
    ref2 = _reference(z2, a2, b2, eps=0.001)
    assert jnp.allclose(out2, ref2, atol=ATOL, rtol=RTOL), "mismatch (row-wise)"

    # Case 4: d_hid = 48 (neither multiple nor divisor of 128)
    #         -> lane-padded + masked row-wise path.
    D3 = 48
    z4 = jax.random.normal(k_z4, (2, 6, D3), dtype=jnp.float32)
    a4 = 1.0 + 0.1 * jax.random.normal(k_a, (D3,), dtype=jnp.float32)
    b4 = 0.1 * jax.random.normal(k_b, (D3,), dtype=jnp.float32)
    out4 = jax.block_until_ready(layer_normalization(z4, a4, b4, eps=0.001))
    ref4 = _reference(z4, a4, b4, eps=0.001)
    assert jnp.allclose(out4, ref4, atol=ATOL, rtol=RTOL), "mismatch (lane-padded)"

    # Case 5: z.size(1) == 1 -> identity passthrough (no kernel).
    z1 = jax.random.normal(k_z, (2, 1, D), dtype=jnp.float32)
    out1 = layer_normalization(z1, a_2, b_2, eps=0.001)
    assert out1 is z1

    print("KERNEL_OK")
</pallas_src>

<mosaic_0001>
module attributes {stable_mosaic.version = 11 : i64} {
  func.func @_ln_packed_kernel(%arg0: i32, %arg1: memref<8x128xf32, #tpu.memory_space<vmem>>, %arg2: memref<1x128xf32, #tpu.memory_space<vmem>>, %arg3: memref<1x128xf32, #tpu.memory_space<vmem>>, %arg4: memref<128x128xbf16, #tpu.memory_space<vmem>>, %arg5: memref<8x128xf32, #tpu.memory_space<vmem>>) attributes {dimension_semantics = [#tpu.dimension_semantics<parallel>], iteration_bounds = array<i64: 1>, scalar_prefetch = 0 : i64, scratch_operands = 0 : i64, tpu.core_type = #tpu.core_type<tc>, window_params = [{transform_indices = @transform_0, window_bounds = array<i64: 8, 128>}, {pipeline_mode = #tpu.pipeline_mode<synchronous>, transform_indices = @transform_1, window_bounds = array<i64: 1, 128>}, {pipeline_mode = #tpu.pipeline_mode<synchronous>, transform_indices = @transform_2, window_bounds = array<i64: 1, 128>}, {pipeline_mode = #tpu.pipeline_mode<synchronous>, transform_indices = @transform_3, window_bounds = array<i64: 128, 128>}, {transform_indices = @transform_4, window_bounds = array<i64: 8, 128>}]} {
    %c0 = arith.constant 0 : index
    %c0_0 = arith.constant 0 : index
    %0 = vector.load %arg1[%c0, %c0_0] : memref<8x128xf32, #tpu.memory_space<vmem>>, vector<8x128xf32>
    %c0_1 = arith.constant 0 : index
    %c0_2 = arith.constant 0 : index
    %1 = vector.load %arg4[%c0_1, %c0_2] : memref<128x128xbf16, #tpu.memory_space<vmem>>, vector<128x128xbf16>
    %2 = arith.truncf %0 : vector<8x128xf32> to vector<8x128xbf16>
    %3 = arith.extf %2 : vector<8x128xbf16> to vector<8x128xf32>
    %4 = arith.subf %0, %3 : vector<8x128xf32>
    %5 = arith.truncf %4 : vector<8x128xf32> to vector<8x128xbf16>
    %cst = arith.constant dense<0.000000e+00> : vector<8x128xf32>
    %6 = tpu.matmul %2, %1, %cst {dimension_numbers = #tpu.dot_dimension_numbers<[1], [0], [0], [1], [0, 0, 1, 1], [], []>} : vector<8x128xbf16>, vector<128x128xbf16>, vector<8x128xf32> -> vector<8x128xf32>
    %cst_3 = arith.constant dense<0.000000e+00> : vector<8x128xf32>
    %7 = tpu.matmul %5, %1, %cst_3 {dimension_numbers = #tpu.dot_dimension_numbers<[1], [0], [0], [1], [0, 0, 1, 1], [], []>} : vector<8x128xbf16>, vector<128x128xbf16>, vector<8x128xf32> -> vector<8x128xf32>
    %8 = arith.addf %6, %7 : vector<8x128xf32>
    %cst_4 = arith.constant 3.125000e-02 : f32
    %9 = vector.broadcast %cst_4 : f32 to vector<8x128xf32>
    %10 = arith.mulf %8, %9 : vector<8x128xf32>
    %11 = arith.subf %0, %10 : vector<8x128xf32>
    %12 = arith.mulf %11, %11 : vector<8x128xf32>
    %13 = arith.truncf %12 : vector<8x128xf32> to vector<8x128xbf16>
    %14 = arith.extf %13 : vector<8x128xbf16> to vector<8x128xf32>
    %15 = arith.subf %12, %14 : vector<8x128xf32>
    %16 = arith.truncf %15 : vector<8x128xf32> to vector<8x128xbf16>
    %cst_5 = arith.constant dense<0.000000e+00> : vector<8x128xf32>
    %17 = tpu.matmul %13, %1, %cst_5 {dimension_numbers = #tpu.dot_dimension_numbers<[1], [0], [0], [1], [0, 0, 1, 1], [], []>} : vector<8x128xbf16>, vector<128x128xbf16>, vector<8x128xf32> -> vector<8x128xf32>
    %cst_6 = arith.constant dense<0.000000e+00> : vector<8x128xf32>
    %18 = tpu.matmul %16, %1, %cst_6 {dimension_numbers = #tpu.dot_dimension_numbers<[1], [0], [0], [1], [0, 0, 1, 1], [], []>} : vector<8x128xbf16>, vector<128x128xbf16>, vector<8x128xf32> -> vector<8x128xf32>
    %19 = arith.addf %17, %18 : vector<8x128xf32>
    %c0_7 = arith.constant 0 : index
    %c0_8 = arith.constant 0 : index
    %20 = vector.load %arg2[%c0_7, %c0_8] : memref<1x128xf32, #tpu.memory_space<vmem>>, vector<1x128xf32>
    %c0_9 = arith.constant 0 : index
    %c0_10 = arith.constant 0 : index
    %21 = vector.load %arg3[%c0_9, %c0_10] : memref<1x128xf32, #tpu.memory_space<vmem>>, vector<1x128xf32>
    %cst_11 = arith.constant 0.0322580636 : f32
    %22 = vector.broadcast %cst_11 : f32 to vector<8x128xf32>
    %23 = arith.mulf %19, %22 : vector<8x128xf32>
    %24 = math.sqrt %23 : vector<8x128xf32>
    %cst_12 = arith.constant 1.000000e-03 : f32
    %25 = vector.broadcast %cst_12 : f32 to vector<8x128xf32>
    %26 = arith.addf %24, %25 : vector<8x128xf32>
    %cst_13 = arith.constant 1.000000e+00 : f32
    %27 = vector.broadcast %cst_13 : f32 to vector<8x128xf32>
    %28 = arith.divf %27, %26 : vector<8x128xf32>
    %29 = arith.mulf %11, %28 : vector<8x128xf32>
    %30 = vector.broadcast %20 : vector<1x128xf32> to vector<8x128xf32>
    %31 = arith.mulf %29, %30 : vector<8x128xf32>
    %32 = vector.broadcast %21 : vector<1x128xf32> to vector<8x128xf32>
    %33 = arith.addf %31, %32 : vector<8x128xf32>
    %c0_14 = arith.constant 0 : index
    %c0_15 = arith.constant 0 : index
    %34 = vector.load %arg5[%c0_14, %c0_15] : memref<8x128xf32, #tpu.memory_space<vmem>>, vector<8x128xf32>
    tpu.vector_store %arg5[%c0_14, %c0_15], %33 {strides = array<i32>} : memref<8x128xf32, #tpu.memory_space<vmem>>, vector<8x128xf32>,
    return
  }
  func.func @transform_0(%arg0: i32) -> (i32, i32) {
    %c0_i32 = arith.constant 0 : i32
    %c0_i32_0 = arith.constant 0 : i32
    return %arg0, %c0_i32 : i32, i32
  }
  func.func @transform_1(%arg0: i32) -> (i32, i32) {
    %c0_i32 = arith.constant 0 : i32
    %c0_i32_0 = arith.constant 0 : i32
    %c0_i32_1 = arith.constant 0 : i32
    return %c0_i32, %c0_i32_0 : i32, i32
  }
  func.func @transform_2(%arg0: i32) -> (i32, i32) {
    %c0_i32 = arith.constant 0 : i32
    %c0_i32_0 = arith.constant 0 : i32
    %c0_i32_1 = arith.constant 0 : i32
    return %c0_i32, %c0_i32_0 : i32, i32
  }
  func.func @transform_3(%arg0: i32) -> (i32, i32) {
    %c0_i32 = arith.constant 0 : i32
    %c0_i32_0 = arith.constant 0 : i32
    %c0_i32_1 = arith.constant 0 : i32
    return %c0_i32, %c0_i32_0 : i32, i32
  }
  func.func @transform_4(%arg0: i32) -> (i32, i32) {
    %c0_i32 = arith.constant 0 : i32
    %c0_i32_0 = arith.constant 0 : i32
    return %arg0, %c0_i32 : i32, i32
  }
}

</mosaic_0001>

<bundles_post_ra>
// kernel: tpu_custom_call.1
= control target key start
LH: loop header
LB: loop body
LE: loop exit
PB: predicated region body
PF: predicated region fallthrough
CT: control target
= control target key end

     0   :  { %9 = vsyncpa [#allocation3], 0  ;;  %s461_s0 = inlined_call_operand.hbm [shape: f32[4,128], index: 0, kind: input, shape index: {}]   ;;  %s462_s1 = inlined_call_operand.hbm [shape: f32[1,128], index: 1, kind: input, shape index: {}]   ;;  %s463_s2 = inlined_call_operand.vmem [shape: f32[1,128], index: 2, kind: input, shape index: {}]   ;;  %s464_s3 = inlined_call_operand.hbm [shape: bf16[128,128], index: 3, kind: input, shape index: {}]   ;;  %s465_s4 = inlined_call_operand.hbm [shape: f32[4,128], index: 4, kind: output, shape index: {}]  }
   0x1   :  { %10 = vsyncpa [#allocation6], 0 }
   0x2   :  { %11 = vsyncpa [#allocation4], 0  ;;  %s30_s17 = sshll.u32 %s462_s1, 4  ;;  %s31_s17 = int_to_ptr.hbm [resolvable:$true] %s30_s17 }
   0x3   :  { %15 = vsyncadd [#allocation3], 64  ;;  %s406_s18 = smov [#allocation5]   ;;  %s16_s22 = sshll.u32 %s461_s0, 4  ;;  %s17_s22 = int_to_ptr.hbm [resolvable:$true] %s16_s22 }
   0x4   :  { %s32_s19 = sshll.u32 %s406_s18, 4  ;;  %s407_s23 = smov [#allocation2]   ;;  %s33_s19 = int_to_ptr.vmem [resolvable:$true] %s32_s19 }
   0x5   :  { %35 = dma.hbm_to_vmem [thread:$0]  %s31_s17, 16, %s33_s19, [#allocation6]  }
   0x6   :  { %s18_s24 = sshll.u32 %s407_s23, 4  ;;  %s408_s25 = smov 64   ;;  %s19_s24 = int_to_ptr.vmem [resolvable:$true] %s18_s24 }
   0x7   :  { %s409_s26 = smov 4   ;;  %s42_s28 = sshll.u32 %s464_s3, 4  ;;  %s43_s28 = int_to_ptr.hbm [resolvable:$true] %s42_s28 }
   0x8   :  { %24 = dma.hbm_to_vmem [thread:$0]  %s17_s22, 64, %s19_s24, [#allocation3], %s408_s25, %s408_s25, %s409_s26  }
   0x9   :  { %s410_s29 = smov [#allocation7]  }
   0xa   :  { %s44_s30 = sshll.u32 %s410_s29, 4  ;;  %s45_s30 = int_to_ptr.vmem [resolvable:$true] %s44_s30 }
   0xb   :  { %50 = dma.hbm_to_vmem [thread:$0]  %s43_s28, 1024, %s45_s30, [#allocation6], %s408_s25, %s408_s25, %s409_s26  }
   0xc   :  { %400 = dma.done.wait [#allocation3], 128  }
   0xd   :  { %401 = vsyncadd [#allocation3], 4294967168 }
   0xe   :  { %402 = dma.done.wait [#allocation6], 1040  }
   0xf   :  { %403 = vsyncadd [#allocation6], 4294966256  ;;  %v291_v0 = vld [vmem:[#allocation7 + $0x38] sm:$0xff]  ;;  %v290_v1 = vld [vmem:[#allocation7 + $0x30] sm:$0xff] }
  0x10   :  { %132 = vmatpush.bf16.msra.mxu0 %v291_v0  ;;  %145 = vmatpush.bf16.msra.mxu1 %v291_v0  ;;  %v289_v2 = vld [vmem:[#allocation7 + $0x28] sm:$0xff]  ;;  %v288_v3 = vld [vmem:[#allocation7 + $0x20] sm:$0xff]  ;;  %v287_v4 = vld [vmem:[#allocation7 + $0x18] sm:$0xff] }
  0x11   :  { %178 = vmatpush.bf16.msra.mxu3 %v291_v0  ;;  %165 = vmatpush.bf16.msra.mxu2 %v291_v0  ;;  %v63_v5 = vld [vmem:[#allocation2] sm:$0xff]  ;;  %v285_v9 = vld [vmem:[#allocation7 + $0x8] sm:$0xff]  ;;  %v284_v11 = vld [vmem:[#allocation7] sm:$0xff] }
  0x12   :  { %v80_v6 = vpack.c.bf16 %v63_v5, %v63_v5  ;;  %v286_v7 = vld [vmem:[#allocation7 + $0x10] sm:$0xff]  ;;  %v298_v51 = vld [vmem:[#allocation5] ss:$0 sm:$0xff] }
  0x13   :  { %v299_v54 = vld [vmem:[%s463_s2] ss:$0 sm:$0xff] }
  0x14   :  { %133 = vmatpush.bf16.msra.mxu0 %v290_v1  ;;  %146 = vmatpush.bf16.msra.mxu1 %v290_v1  ;;  %v81_v8 = vunpack.c.l.bf16 %v80_v6 }
  0x15   :  { %179 = vmatpush.bf16.msra.mxu3 %v290_v1  ;;  %166 = vmatpush.bf16.msra.mxu2 %v290_v1 }
  0x16   :  { %v82_v10 = vsub.f32 %v63_v5, %v81_v8 }
  0x18   :  { %134 = vmatpush.bf16.msra.mxu0 %v289_v2  ;;  %147 = vmatpush.bf16.msra.mxu1 %v289_v2  ;;  %v83_v12 = vpack.c.bf16 %v82_v10, %v82_v10 }
  0x19   :  { %180 = vmatpush.bf16.msra.mxu3 %v289_v2  ;;  %167 = vmatpush.bf16.msra.mxu2 %v289_v2 }
  0x1c   :  { %135 = vmatpush.bf16.msra.mxu0 %v288_v3  ;;  %148 = vmatpush.bf16.msra.mxu1 %v288_v3 }
  0x1d   :  { %181 = vmatpush.bf16.msra.mxu3 %v288_v3  ;;  %168 = vmatpush.bf16.msra.mxu2 %v288_v3 }
  0x20   :  { %136 = vmatpush.bf16.msra.mxu0 %v287_v4  ;;  %149 = vmatpush.bf16.msra.mxu1 %v287_v4 }
  0x21   :  { %182 = vmatpush.bf16.msra.mxu3 %v287_v4  ;;  %169 = vmatpush.bf16.msra.mxu2 %v287_v4 }
  0x24   :  { %137 = vmatpush.bf16.msra.mxu0 %v286_v7  ;;  %150 = vmatpush.bf16.msra.mxu1 %v286_v7 }
  0x25   :  { %183 = vmatpush.bf16.msra.mxu3 %v286_v7  ;;  %170 = vmatpush.bf16.msra.mxu2 %v286_v7 }
  0x28   :  { %138 = vmatpush.bf16.msra.mxu0 %v285_v9  ;;  %151 = vmatpush.bf16.msra.mxu1 %v285_v9 }
  0x29   :  { %184 = vmatpush.bf16.msra.mxu3 %v285_v9  ;;  %171 = vmatpush.bf16.msra.mxu2 %v285_v9 }
  0x2c   :  { %139 = vmatpush.bf16.msra.mxu0 %v284_v11  ;;  %152 = vmatpush.bf16.msra.mxu1 %v284_v11 }
  0x2d   :  { %185 = vmatpush.bf16.msra.mxu3 %v284_v11  ;;  %172 = vmatpush.bf16.msra.mxu2 %v284_v11 }
  0x2f   :  { %140 = vmatmul.bf16.vlgmr.msra.gmra.mxu0 %v83_v12  ;;  %153 = vmatmul.bf16.vlgmr.msra.gmra.mxu1 %v80_v6 }
  0xac   :  { %v141_v13 = vpop.f32.mrf.mxu0  ;;  %v154_v14 = vpop.f32.mrf.mxu1 }
  0xad   :  { %v155_v15 = vadd.f32 %v154_v14, %v141_v13 }
  0xaf   :  { %v158_v16 = vmul.f32 0.03125, %v155_v15 }
  0xb1   :  { %v159_v17 = vsub.f32 %v63_v5, %v158_v16 }
  0xb3   :  { %v160_v18 = vmul.f32 %v159_v17, %v159_v17 }
  0xb4   :  { %v143_v19 = vpop.f32.mrf.mxu0  ;;  %v156_v20 = vpop.f32.mrf.mxu1 }
  0xb5   :  { %v161_v21 = vpack.c.bf16 %v160_v18, %v160_v18 }
  0xb7   :  { %v162_v22 = vunpack.c.l.bf16 %v161_v21  ;;  %186 = vmatmul.bf16.vlgmr.msra.gmra.mxu3 %v161_v21 }
  0xb9   :  { %v163_v23 = vsub.f32 %v160_v18, %v162_v22 }
  0xbb   :  { %v164_v24 = vpack.c.bf16 %v163_v23, %v163_v23 }
  0xbd   :  { %173 = vmatmul.bf16.vlgmr.msra.gmra.mxu2 %v164_v24 }
 0x13a   :  { %v187_v25 = vpop.f32.mrf.mxu3 }
 0x140   :  { %v174_v26 = vpop.f32.mrf.mxu2 }
 0x141   :  { %v188_v27 = vadd.f32 %v187_v25, %v174_v26 }
 0x142   :  { %v189_v28 = vpop.f32.mrf.mxu3 }
 0x143   :  { %v193_v29 = vmul.f32 0.032258064, %v188_v27 }
 0x145   :  { %300 = vrsqrt.f32 %v193_v29  ;;  %vm201_vm0 = vcmp.eq.f32.partialorder %v193_v29, inf  ;;  %v204_v38 = vand.u32 2147483648, %v193_v29  ;;  %vm203_vm1 = vcmp.eq.f32.partialorder %v193_v29, 0.0 }
 0x148   :  { %v176_v30 = vpop.f32.mrf.mxu2 }
 0x14b   :  { %v301_v31 = vpop.eup %300 }
 0x14c   :  { %v195_v32 = vmul.f32 %v301_v31, %v193_v29 }
 0x14e   :  { %v196_v33 = vmul.f32 %v301_v31, %v195_v32 }
 0x150   :  { %v197_v34 = vmul.f32 0.5, %v196_v33 }
 0x152   :  { %v198_v35 = vsub.f32 1.5, %v197_v34 }
 0x154   :  { %v199_v36 = vmul.f32 %v301_v31, %v198_v35 }
 0x156   :  { %v200_v37 = vmul.f32 %v199_v36, %v193_v29 }
 0x158   :  { %v202_v39 = vsel %vm201_vm0, %v193_v29, %v200_v37 }
 0x159   :  { %v205_v40 = vsel %vm203_vm1, %v204_v38, %v202_v39 }
 0x15a   :  { %v206_v41 = vadd.f32 0.001, %v205_v40 }
 0x15c   :  { %302 = vrcp.f32 %v206_v41  ;;  %v218_v45 = vand.u32 2147483648, %v206_v41  ;;  %v216_v47 = vand.u32 2147483647, %v206_v41  ;;  %vm212_vm3 = vweird.f32 %v206_v41 }
 0x15e   :  { %v219_v49 = vor.u32 1.1754944e-38, %v218_v45  ;;  %vm217_vm5 = vcmp.eq.f32.partialorder %v216_v47, 8.507059e+37 }
 0x162   :  { %v303_v42 = vpop.eup %302 }
 0x163   :  { %v208_v43 = vmul.f32 %v303_v42, %v206_v41  ;;  %vm213_vm2 = vweird.f32 %v303_v42 }
 0x164   :  { %vm214_vm4 = vmor %vm212_vm3, %vm213_vm2 }
 0x165   :  { %v209_v44 = vsub.f32 1.0, %v208_v43 }
 0x167   :  { %v210_v46 = vmul.f32 %v303_v42, %v209_v44 }
 0x169   :  { %v211_v48 = vadd.f32 %v303_v42, %v210_v46 }
 0x16b   :  { %v215_v50 = vsel %vm214_vm4, %v303_v42, %v211_v48 }
 0x16c   :  { %v220_v52 = vsel %vm217_vm5, %v219_v49, %v215_v50 }
 0x16d   :  { %v222_v53 = vmul.f32 %v220_v52, %v159_v17 }
 0x16f   :  { %v226_v55 = vmul.f32 %v298_v51, %v222_v53 }
 0x171   :  { %v230_v56 = vadd.f32 %v299_v54, %v226_v55 }
 0x173   :  { %231 = vst [vmem:[#allocation8] sm:$0xff] %v230_v56 }
 0x174   :  { %235 = vsyncadd [#allocation4], 64  ;;  %s238_s7 = sshll.u32 %s465_s4, 4  ;;  %s411_s8 = smov [#allocation8]   ;;  %s239_s7 = int_to_ptr.hbm [resolvable:$true] %s238_s7 }
 0x175   :  { %s236_s9 = sshll.u32 %s411_s8, 4  ;;  %s237_s9 = int_to_ptr.vmem [resolvable:$true] %s236_s9 }
 0x176   :  { %244 = dma.vmem_to_hbm [thread:$0]  %s237_s9, 64, %s239_s7, [#allocation4], %s408_s25, %s408_s25, %s409_s26  }
 0x177   :  { %404 = dma.done.wait [#allocation4], 128  }
 0x178   :  { %405 = vsyncadd [#allocation4], 4294967168 }
 0x179   :  { %249 = vsyncpa [#allocation3], 1 }
 0x17a   :  { %250 = vsyncpa [#allocation6], 1 }
 0x17b   :  { %251 = vsyncpa [#allocation4], 1 }

</bundles_post_ra>
